<compile_context>
chip_gen: v6e
topology: v6e:2x2x1
jax: 0.10.0
libtpu: 0.0.40
codegen_flags: <defaults>
</compile_context>

<pallas_src>
import jax
import jax.numpy as jnp
import numpy as np
from jax.experimental import pallas as pl
from jax.experimental.pallas import tpu as pltpu

_HIDDEN = 100        # fc1 out_features in the PyTorch module
_HIDDEN_PAD = 128    # padded to a full lane width (zeros in cols 100..127)


def _round_up(n, m):
    return ((n + m - 1) // m) * m


def _mlp_value_kernel(x_ref, pos_ref, w1x_ref, w1p_ref, b1_ref, w2c_ref, b2_ref,
                      o_ref):
    """One batch tile: y = relu(x@W1x + pos@W1p + b1) @ w2_col + b2.

    x_ref  : [TB, 64]   batch tile of x            (bf16 or f32)
    pos_ref: [TB, 2]    batch tile of pos          (same dtype as x)
    w1x_ref: [64, 128]  fc1 weight rows for x      (same dtype as x)
    w1p_ref: [2, 128]   fc1 weight rows for pos    (same dtype as x)
    b1_ref : [1, 128]   fc1 bias (zero-padded)     (f32)
    w2c_ref: [128, 1]   fc2 weight as a zero-padded column (same dtype as x)
    b2_ref : [1, 1]     fc2 bias                   (f32)
    o_ref  : [TB, 1]    output                     (f32)
    """
    # fc1: both the 64-feature x part and the 2-feature pos part run on the
    # MXU with f32 accumulation (keeps the VALU/XLU slots free).
    h = jnp.dot(x_ref[...], w1x_ref[...], preferred_element_type=jnp.float32)
    h = h + jnp.dot(pos_ref[...], w1p_ref[...],
                    preferred_element_type=jnp.float32)

    # Bias + ReLU on the VPU in f32.  Padded hidden columns (100..127) are
    # exactly zero because w1x/w1p/b1 are zero-padded there.
    h = jnp.maximum(h + b1_ref[...], 0.0)

    # fc2 (out_features == 1) as an MXU matmul against a [128, 1] column
    # (replaces the old VPU multiply + XLU lane reduction).  Padded rows of
    # w2c are zero, so the padded hidden columns contribute nothing.
    y = jnp.dot(h.astype(w2c_ref.dtype), w2c_ref[...],
                preferred_element_type=jnp.float32)
    o_ref[...] = (y + b2_ref[...]).astype(o_ref.dtype)


def mlp_value64_forward(x, pos, w1, b1, w2, b2, *, block_b=8192,
                        compute_dtype=jnp.bfloat16):
    """Forward pass of MLPValue64.

    x  : [B, state_dim]        (any float dtype; cast to compute_dtype)
    pos: [B, 2]
    w1 : [state_dim + 2, 100]  fc1 weight stored [in, out] (transposed vs torch)
    b1 : [100]
    w2 : [100, 1]              fc2 weight stored [in, out]
    b2 : [1]
    returns [B, 1] float32
    """
    B, state_dim = x.shape
    assert pos.shape == (B, 2)
    assert w1.shape == (state_dim + 2, _HIDDEN)

    cdt = jnp.dtype(compute_dtype)  # MXU input dtype; accumulation is f32

    # ---- one-off parameter prep (KB-sized tensors) -------------------------
    pad_h = _HIDDEN_PAD - _HIDDEN
    w1_pad = jnp.pad(w1.astype(jnp.float32), ((0, 0), (0, pad_h)))
    w1x = w1_pad[:state_dim].astype(cdt)                                # [64,128]
    w1p = w1_pad[state_dim:].astype(cdt)                                # [2,128]
    b1p = jnp.pad(b1.astype(jnp.float32), (0, pad_h)).reshape(1, _HIDDEN_PAD)
    w2c = jnp.pad(w2.astype(jnp.float32), ((0, pad_h), (0, 0))).astype(cdt)  # [128,1]
    b2r = b2.astype(jnp.float32).reshape(1, 1)                          # [1,1]

    # ---- batch tiling -------------------------------------------------------
    # Adaptive tile: tiny batches get a single small block, large batches get
    # a pipelined grid (8192 rows by default).  Rows are independent and
    # out-of-range output rows of a partial last block are dropped by Pallas,
    # so partial edge blocks are fine.  (Never add a cross-row reduction to
    # this kernel without masking those padded rows.)
    tb = _round_up(min(block_b, _round_up(B, 8)), 8)
    grid = (pl.cdiv(B, tb),)

    def _resident(shape):
        return pl.BlockSpec(shape, lambda i: (0, 0))

    out = pl.pallas_call(
        _mlp_value_kernel,
        out_shape=jax.ShapeDtypeStruct((B, 1), jnp.float32),
        grid=grid,
        in_specs=[
            pl.BlockSpec((tb, state_dim), lambda i: (i, 0)),   # x tile
            pl.BlockSpec((tb, 2), lambda i: (i, 0)),           # pos tile
            _resident((state_dim, _HIDDEN_PAD)),               # w1x (resident)
            _resident((2, _HIDDEN_PAD)),                       # w1p (resident)
            _resident((1, _HIDDEN_PAD)),                       # b1  (resident)
            _resident((_HIDDEN_PAD, 1)),                       # w2 column (resident)
            _resident((1, 1)),                                 # b2  (resident)
        ],
        out_specs=pl.BlockSpec((tb, 1), lambda i: (i, 0)),
        compiler_params=pltpu.CompilerParams(
            dimension_semantics=("parallel",),
            vmem_limit_bytes=48 * 1024 * 1024,
        ),
        cost_estimate=pl.CostEstimate(
            flops=2 * B * (state_dim + 2) * _HIDDEN + 2 * B * _HIDDEN,
            transcendentals=0,
            bytes_accessed=(B * (state_dim + 2) * cdt.itemsize
                            + B * 4
                            + (state_dim + 2 + 1) * _HIDDEN_PAD * cdt.itemsize),
        ),
    )(x.astype(cdt), pos.astype(cdt), w1x, w1p, b1p, w2c, b2r)
    return out


def init_params(state_dim=64, seed=0):
    """Deterministic params mirroring the PyTorch module shapes.

    fc1.weight: kaiming normal (fan_in = state_dim + 2) -> std = sqrt(2 / fan_in)
    fc2.weight: xavier normal  -> std = sqrt(2 / (fan_in + fan_out))
    biases: PyTorch default uniform(-1/sqrt(fan_in), 1/sqrt(fan_in))
    Weights are returned already transposed to [in, out] for the kernel.
    """
    key = jax.random.PRNGKey(seed)
    k1, k2, k3, k4 = jax.random.split(key, 4)
    in1, out1 = state_dim + 2, _HIDDEN
    in2, out2 = _HIDDEN, 1

    w1 = jax.random.normal(k1, (in1, out1), jnp.float32) * np.sqrt(2.0 / in1)
    b1 = jax.random.uniform(k2, (out1,), jnp.float32,
                            minval=-1.0 / np.sqrt(in1), maxval=1.0 / np.sqrt(in1))
    w2 = jax.random.normal(k3, (in2, out2), jnp.float32) * np.sqrt(2.0 / (in2 + out2))
    b2 = jax.random.uniform(k4, (out2,), jnp.float32,
                            minval=-1.0 / np.sqrt(in2), maxval=1.0 / np.sqrt(in2))
    return w1, b1, w2, b2


if __name__ == "__main__":
    state_dim = 64
    batch = 16   # small demo batch; multiple of 16 so bf16 blocks are full-dim

    key = jax.random.PRNGKey(0)
    kx, kp = jax.random.split(key)
    x = jax.random.normal(kx, (batch, state_dim), jnp.float32)
    pos = jax.random.normal(kp, (batch, 2), jnp.float32)

    w1, b1, w2, b2 = init_params(state_dim=state_dim, seed=0)

    fwd = jax.jit(mlp_value64_forward, static_argnames=("block_b", "compute_dtype"))
    out = jax.block_until_ready(fwd(x, pos, w1, b1, w2, b2))

    # Tight check against a reference that applies the same bf16 input/weight
    # quantization as the kernel (f32 accumulation everywhere), so the only
    # residual difference is accumulation order.
    f32, bf = jnp.float32, jnp.bfloat16
    xq = x.astype(bf).astype(f32)
    pq = pos.astype(bf).astype(f32)
    w1q = w1.astype(bf).astype(f32)
    w2q = w2.astype(bf).astype(f32)
    h_ref = jnp.maximum(jnp.concatenate([xq, pq], axis=1) @ w1q + b1, 0.0)
    ref_q = h_ref.astype(bf).astype(f32) @ w2q + b2
    np.testing.assert_allclose(np.asarray(out), np.asarray(ref_q),
                               rtol=1e-3, atol=1e-3)

    # Sanity check against the full-precision f32 reference (bf16 quantization
    # of activations + weights only).
    ref = jnp.maximum(jnp.concatenate([x, pos], axis=1) @ w1 + b1, 0.0) @ w2 + b2
    np.testing.assert_allclose(np.asarray(out), np.asarray(ref),
                               rtol=5e-2, atol=5e-2)

    print("KERNEL_OK")
</pallas_src>

<mosaic_0001>
module attributes {stable_mosaic.version = 11 : i64} {
  func.func @_mlp_value_kernel(%arg0: i32, %arg1: memref<16x64xbf16, #tpu.memory_space<vmem>>, %arg2: memref<16x2xbf16, #tpu.memory_space<vmem>>, %arg3: memref<64x128xbf16, #tpu.memory_space<vmem>>, %arg4: memref<2x128xbf16, #tpu.memory_space<vmem>>, %arg5: memref<1x128xf32, #tpu.memory_space<vmem>>, %arg6: memref<128x1xbf16, #tpu.memory_space<vmem>>, %arg7: memref<1x1xf32, #tpu.memory_space<vmem>>, %arg8: memref<16x1xf32, #tpu.memory_space<vmem>>) attributes {dimension_semantics = [#tpu.dimension_semantics<parallel>], iteration_bounds = array<i64: 1>, scalar_prefetch = 0 : i64, scratch_operands = 0 : i64, tpu.core_type = #tpu.core_type<tc>, window_params = [{transform_indices = @transform_0, window_bounds = array<i64: 16, 64>}, {transform_indices = @transform_1, window_bounds = array<i64: 16, 2>}, {pipeline_mode = #tpu.pipeline_mode<synchronous>, transform_indices = @transform_2, window_bounds = array<i64: 64, 128>}, {pipeline_mode = #tpu.pipeline_mode<synchronous>, transform_indices = @transform_3, window_bounds = array<i64: 2, 128>}, {pipeline_mode = #tpu.pipeline_mode<synchronous>, transform_indices = @transform_4, window_bounds = array<i64: 1, 128>}, {pipeline_mode = #tpu.pipeline_mode<synchronous>, transform_indices = @transform_5, window_bounds = array<i64: 128, 1>}, {pipeline_mode = #tpu.pipeline_mode<synchronous>, transform_indices = @transform_6, window_bounds = array<i64: 1, 1>}, {transform_indices = @transform_7, window_bounds = array<i64: 16, 1>}]} {
    %c0 = arith.constant 0 : index
    %c0_0 = arith.constant 0 : index
    %0 = vector.load %arg1[%c0, %c0_0] : memref<16x64xbf16, #tpu.memory_space<vmem>>, vector<16x64xbf16>
    %c0_1 = arith.constant 0 : index
    %c0_2 = arith.constant 0 : index
    %1 = vector.load %arg3[%c0_1, %c0_2] : memref<64x128xbf16, #tpu.memory_space<vmem>>, vector<64x128xbf16>
    %cst = arith.constant dense<0.000000e+00> : vector<16x128xf32>
    %2 = tpu.matmul %0, %1, %cst {dimension_numbers = #tpu.dot_dimension_numbers<[1], [0], [0], [1], [0, 0, 1, 1], [], []>} : vector<16x64xbf16>, vector<64x128xbf16>, vector<16x128xf32> -> vector<16x128xf32>
    %c0_3 = arith.constant 0 : index
    %c0_4 = arith.constant 0 : index
    %3 = vector.load %arg2[%c0_3, %c0_4] : memref<16x2xbf16, #tpu.memory_space<vmem>>, vector<16x2xbf16>
    %c0_5 = arith.constant 0 : index
    %c0_6 = arith.constant 0 : index
    %4 = vector.load %arg4[%c0_5, %c0_6] : memref<2x128xbf16, #tpu.memory_space<vmem>>, vector<2x128xbf16>
    %cst_7 = arith.constant dense<0.000000e+00> : vector<16x128xf32>
    %5 = tpu.matmul %3, %4, %cst_7 {dimension_numbers = #tpu.dot_dimension_numbers<[1], [0], [0], [1], [0, 0, 1, 1], [], []>} : vector<16x2xbf16>, vector<2x128xbf16>, vector<16x128xf32> -> vector<16x128xf32>
    %6 = arith.addf %2, %5 : vector<16x128xf32>
    %c0_8 = arith.constant 0 : index
    %c0_9 = arith.constant 0 : index
    %7 = vector.load %arg5[%c0_8, %c0_9] : memref<1x128xf32, #tpu.memory_space<vmem>>, vector<1x128xf32>
    %8 = vector.broadcast %7 : vector<1x128xf32> to vector<16x128xf32>
    %9 = arith.addf %6, %8 : vector<16x128xf32>
    %cst_10 = arith.constant 0.000000e+00 : f32
    %10 = vector.broadcast %cst_10 : f32 to vector<16x128xf32>
    %11 = arith.maximumf %9, %10 : vector<16x128xf32>
    %12 = arith.truncf %11 : vector<16x128xf32> to vector<16x128xbf16>
    %c0_11 = arith.constant 0 : index
    %c0_12 = arith.constant 0 : index
    %13 = vector.load %arg6[%c0_11, %c0_12] : memref<128x1xbf16, #tpu.memory_space<vmem>>, vector<128x1xbf16>
    %cst_13 = arith.constant dense<0.000000e+00> : vector<16x1xf32>
    %14 = tpu.matmul %12, %13, %cst_13 {dimension_numbers = #tpu.dot_dimension_numbers<[1], [0], [0], [1], [0, 0, 1, 1], [], []>} : vector<16x128xbf16>, vector<128x1xbf16>, vector<16x1xf32> -> vector<16x1xf32>
    %c0_14 = arith.constant 0 : index
    %c0_15 = arith.constant 0 : index
    %15 = vector.load %arg7[%c0_14, %c0_15] : memref<1x1xf32, #tpu.memory_space<vmem>>, vector<1x1xf32>
    %16 = vector.broadcast %15 : vector<1x1xf32> to vector<16x1xf32>
    %17 = arith.addf %14, %16 : vector<16x1xf32>
    %c0_16 = arith.constant 0 : index
    %c0_17 = arith.constant 0 : index
    %18 = vector.load %arg8[%c0_16, %c0_17] : memref<16x1xf32, #tpu.memory_space<vmem>>, vector<16x1xf32>
    tpu.vector_store %arg8[%c0_16, %c0_17], %17 {strides = array<i32>} : memref<16x1xf32, #tpu.memory_space<vmem>>, vector<16x1xf32>,
    return
  }
  func.func @transform_0(%arg0: i32) -> (i32, i32) {
    %c0_i32 = arith.constant 0 : i32
    %c0_i32_0 = arith.constant 0 : i32
    return %arg0, %c0_i32 : i32, i32
  }
  func.func @transform_1(%arg0: i32) -> (i32, i32) {
    %c0_i32 = arith.constant 0 : i32
    %c0_i32_0 = arith.constant 0 : i32
    return %arg0, %c0_i32 : i32, i32
  }
  func.func @transform_2(%arg0: i32) -> (i32, i32) {
    %c0_i32 = arith.constant 0 : i32
    %c0_i32_0 = arith.constant 0 : i32
    %c0_i32_1 = arith.constant 0 : i32
    return %c0_i32, %c0_i32_0 : i32, i32
  }
  func.func @transform_3(%arg0: i32) -> (i32, i32) {
    %c0_i32 = arith.constant 0 : i32
    %c0_i32_0 = arith.constant 0 : i32
    %c0_i32_1 = arith.constant 0 : i32
    return %c0_i32, %c0_i32_0 : i32, i32
  }
  func.func @transform_4(%arg0: i32) -> (i32, i32) {
    %c0_i32 = arith.constant 0 : i32
    %c0_i32_0 = arith.constant 0 : i32
    %c0_i32_1 = arith.constant 0 : i32
    return %c0_i32, %c0_i32_0 : i32, i32
  }
  func.func @transform_5(%arg0: i32) -> (i32, i32) {
    %c0_i32 = arith.constant 0 : i32
    %c0_i32_0 = arith.constant 0 : i32
    %c0_i32_1 = arith.constant 0 : i32
    return %c0_i32, %c0_i32_0 : i32, i32
  }
  func.func @transform_6(%arg0: i32) -> (i32, i32) {
    %c0_i32 = arith.constant 0 : i32
    %c0_i32_0 = arith.constant 0 : i32
    %c0_i32_1 = arith.constant 0 : i32
    return %c0_i32, %c0_i32_0 : i32, i32
  }
  func.func @transform_7(%arg0: i32) -> (i32, i32) {
    %c0_i32 = arith.constant 0 : i32
    %c0_i32_0 = arith.constant 0 : i32
    return %arg0, %c0_i32 : i32, i32
  }
}

</mosaic_0001>

<bundles_post_ra>
// kernel: mlp_value64_forward.1
= control target key start
LH: loop header
LB: loop body
LE: loop exit
PB: predicated region body
PF: predicated region fallthrough
CT: control target
= control target key end

     0   :  { %vm51_vm0 = vcmask 1040384   ;;  %v389_v0 = vmov 0.0   ;;  %vm390_vm1 = vmmov 0   ;;  %vm47_vm2 = vcmask 15360   ;;  %s488_s3 = inlined_call_operand.vmem [shape: bf16[2,128], index: 3, kind: input, shape index: {}]   ;;  %s489_s1 = inlined_call_operand.vmem [shape: bf16[16,2], index: 1, kind: input, shape index: {}]   ;;  %s490_s2 = inlined_call_operand.vmem [shape: bf16[64,128], index: 2, kind: input, shape index: {}]   ;;  %s491_s0 = inlined_call_operand.vmem [shape: bf16[16,64], index: 0, kind: input, shape index: {}]   ;;  %s492_s5 = inlined_call_operand.vmem [shape: bf16[128,1], index: 5, kind: input, shape index: {}]   ;;  %s493_s6 = inlined_call_operand.<no memory space> [shape: f32[1,1], index: 6, kind: input, shape index: {}]   ;;  %s494_s4 = inlined_call_operand.vmem [shape: f32[1,128], index: 4, kind: input, shape index: {}]   ;;  %s495_s7 = inlined_call_operand.vmem [shape: f32[16,1], index: 7, kind: output, shape index: {}]  }
   0x1   :  { %335 = vmatprep.subr.bf16.mxu1 %v389_v0  ;;  %v41_v1 = vld [vmem:[%s488_s3] sm:$0x1]  ;;  %337 = vmatprep.mubr.msk.bf16.mxu1 %vm390_vm1, %v389_v0  ;;  %v376_v4 = vld [vmem:[%s490_s2 + $0x18] sm:$0xff]   ;;  %v377_v5 = vld [vmem:[%s490_s2 + $0x10] sm:$0xff]   ;;  %vm125_vm3 = vcmask 523264   ;;  %v12_v17 = vstv %s493_s6  ;;  %vm294_vm4 = vcmask 7168  }
   0x2   :  { %v53_v2 = vsel %vm51_vm0, %v41_v1, 0  ;;  %v375_v3 = vld [vmem:[%s489_s1] sm:$0xff]   ;;  %353 = vmatprep.subr.bf16.mxu0 %v389_v0  ;;  %369 = vmatprep.mubr.msk.bf16.mxu0 %vm390_vm1, %v389_v0  ;;  %v381_v6 = vld [vmem:[%s492_s5 + $0x38] sm:$0xff]   ;;  %v378_v7 = vld [vmem:[%s490_s2 + $0x8] sm:$0xff]   ;;  %13 = vst [vmem:[#allocation2] sm:$0x1] %v12_v17 }
   0x3   :  { %336 = vmatpush3.bf16.msra.mxu1 %v53_v2  ;;  %354 = vmatpush3.bf16.msra.mxu0 %v381_v6  ;;  %v379_v8 = vld [vmem:[%s490_s2] sm:$0xff]   ;;  %v382_v10 = vld [vmem:[%s492_s5 + $0x30] sm:$0xff]   ;;  %v383_v11 = vld [vmem:[%s492_s5 + $0x28] sm:$0xff]  }
   0x4   :  { %341 = vmatprep.subr.bf16.mxu1 %v389_v0  ;;  %355 = vmatprep.subr.bf16.mxu0 %v389_v0  ;;  %v380_v9 = vld [vmem:[%s491_s0] sm:$0xff]   ;;  %v385_v13 = vld [vmem:[%s492_s5 + $0x18] sm:$0xff]   ;;  %v386_v14 = vld [vmem:[%s492_s5 + $0x10] sm:$0xff]  }
   0x5   :  { %v384_v12 = vld [vmem:[%s492_s5 + $0x20] sm:$0xff]   ;;  %v387_v15 = vld [vmem:[%s492_s5 + $0x8] sm:$0xff]  }
   0x6   :  { %338 = vmatmul.mubr.msk.bf16.vlgmr.msra.gmra.mxu1 %vm47_vm2, %v375_v3  ;;  %v388_v16 = vld [vmem:[%s492_s5] sm:$0xff]  }
   0x7   :  { %342 = vmatpush3.bf16.msra.mxu1 %v376_v4  ;;  %349 = vmatprep.mubr.msk.bf16.mxu1 %vm390_vm1, %v389_v0  ;;  %v309_v24 = vld [vmem:[%s494_s4] ss:$0 sm:$0xff] }
   0x8   :  { %343 = vmatprep.subr.bf16.mxu1 %v389_v0  ;;  %356 = vmatpush3.bf16.msra.mxu0 %v382_v10 }
   0x9   :  { %357 = vmatprep.subr.bf16.mxu0 %v389_v0  ;;  %v310_v34 = vld [vmem:[#allocation2] ss:$0 sm:$0xff] }
   0xb   :  { %344 = vmatpush3.bf16.msra.mxu1 %v377_v5 }
   0xc   :  { %345 = vmatprep.subr.bf16.mxu1 %v389_v0  ;;  %358 = vmatpush3.bf16.msra.mxu0 %v383_v11 }
   0xd   :  { %359 = vmatprep.subr.bf16.mxu0 %v389_v0 }
   0xf   :  { %346 = vmatpush3.bf16.msra.mxu1 %v378_v7 }
  0x10   :  { %347 = vmatprep.subr.bf16.mxu1 %v389_v0  ;;  %360 = vmatpush3.bf16.msra.mxu0 %v384_v12 }
  0x11   :  { %361 = vmatprep.subr.bf16.mxu0 %v389_v0 }
  0x13   :  { %348 = vmatpush3.bf16.msra.mxu1 %v379_v8 }
  0x14   :  { %362 = vmatpush3.bf16.msra.mxu0 %v385_v13 }
  0x15   :  { %363 = vmatprep.subr.bf16.mxu0 %v389_v0 }
  0x16   :  { %350 = vmatmul.mubr.msk.bf16.vlgmr.msra.gmra.mxu1 %vm125_vm3, %v380_v9 }
  0x18   :  { %364 = vmatpush3.bf16.msra.mxu0 %v386_v14 }
  0x19   :  { %365 = vmatprep.subr.bf16.mxu0 %v389_v0 }
  0x1c   :  { %366 = vmatpush3.bf16.msra.mxu0 %v387_v15 }
  0x1d   :  { %367 = vmatprep.subr.bf16.mxu0 %v389_v0 }
  0x20   :  { %368 = vmatpush3.bf16.msra.mxu0 %v388_v16 }
  0xc6   :  { %v89_v18 = vpop.f32.mrf.mxu1 }
  0xc8   :  { %v339_v19 = vpop.f32.mrf.mxu1 }
  0xca   :  { %v92_v20 = vpop.f32.mrf.mxu1 }
  0xcc   :  { %v340_v21 = vpop.f32.mrf.mxu1 }
  0xd6   :  { %v163_v22 = vpop.f32.mrf.mxu1 }
  0xd7   :  { %v164_v23 = vadd.f32 %v163_v22, %v89_v18 }
  0xd8   :  { %v351_v25 = vpop.f32.mrf.mxu1 }
  0xd9   :  { %v177_v27 = vadd.f32 %v309_v24, %v164_v23 }
  0xda   :  { %v166_v26 = vpop.f32.mrf.mxu1 }
  0xdb   :  { %v167_v28 = vadd.f32 %v166_v26, %v92_v20  ;;  %v179_v31 = vmax.f32 %v177_v27, 0.0 }
  0xdc   :  { %v352_v29 = vpop.f32.mrf.mxu1 }
  0xdd   :  { %v178_v30 = vadd.f32 %v309_v24, %v167_v28 }
  0xdf   :  { %v180_v32 = vmax.f32 %v178_v30, 0.0 }
  0xe1   :  { %v181_v33 = vpack.c.bf16 %v180_v32, %v179_v31 }
  0xe3   :  { %370 = vmatmul.mubr.bf16.vlgmr.msra.gmra.mxu0 %v181_v33 }
 0x1a3   :  { %v287_v35 = vpop.f32.mrf.mxu0 }
 0x1a4   :  { %v288_v36 = vadd.f32 %v310_v34, %v287_v35 }
 0x1a5   :  { %v371_v37 = vpop.f32.mrf.mxu0 }
 0x1a6   :  { %295 = vst.msk [vmem:[%s495_s7] sm:$0xff] %vm294_vm4, %v288_v36 }
 0x1a7   :  { %v290_v38 = vpop.f32.mrf.mxu0 }
 0x1a8   :  { %v291_v39 = vadd.f32 %v310_v34, %v290_v38 }
 0x1a9   :  { %v372_v40 = vpop.f32.mrf.mxu0 }
 0x1aa   :  { %296 = vst.msk [vmem:[%s495_s7 + $0x8] sm:$0xff] %vm294_vm4, %v291_v39 }

</bundles_post_ra>
